<compile_context>
chip_gen: v7x
topology: tpu7x:2x2x1
jax: 0.10.0
libtpu: 0.0.40
codegen_flags: <defaults>
</compile_context>

<pallas_src>
import math

import jax
import jax.numpy as jnp
from jax import lax
from jax.experimental import pallas as pl
from jax.experimental.pallas import tpu as pltpu

# ----------------------------------------------------------------------------
# Configuration (mirrors MultiscaleHDenseTransformer.__init__ arguments)
# ----------------------------------------------------------------------------
IN_CHANNELS = 8
OUT_CHANNELS = 16            # GroupNorm(16, out_channels) => divisible by 16
RESOLUTION = 0.5
GRID_EXTENTS = (-4.0, 1.0, 4.0, 9.0)   # (x1, z1, x2, z2)
XMIN, XMAX = -4.0, 4.0
YMIN, YMAX = -1.0, 1.0
ZMIN_ARG, ZMAX_ARG = 1.0, 2.0
FOCAL_LENGTH = 8.0
GROUPS = 1                   # TODO(synk): groups>1 (block-diagonal Conv1d fc) not implemented
GN_GROUPS = 16
GN_EPS = 1e-5

XMIN_G, ZMIN_G, XMAX_G, ZMAX_G = GRID_EXTENTS
IN_HEIGHT = math.ceil(FOCAL_LENGTH * (YMAX - YMIN) / ZMIN_G)                       # 16
IN_WIDTH = math.ceil(RESOLUTION / 2 * FOCAL_LENGTH * (XMAX - XMIN) / ZMAX_ARG)     # 8
YMID = (YMIN + YMAX) / 2
OUT_DEPTH = math.ceil((ZMAX_G - ZMIN_G) / RESOLUTION)                              # 16

GN_GROUP_SIZE = OUT_CHANNELS // GN_GROUPS
# TODO(synk): GroupNorm with group_size > 1 needs cross-channel (sublane) group pooling;
# this module's config (GroupNorm(16, 16)) has group_size == 1 (per-channel stats).
assert GN_GROUP_SIZE == 1, "only group_size == 1 GroupNorm is implemented"

FC_OUT = OUT_CHANNELS * OUT_DEPTH          # 256
WH = IN_WIDTH * IN_HEIGHT                  # 128  (flattened as w*H + h)


# ----------------------------------------------------------------------------
# Fused Pallas kernel: 1x1 Conv2d + GroupNorm + ReLU + fc matmul (per batch)
#
#   x_ref  : (1, Cin, W*H)      x[cin, w*H + h]  = cropped[b, cin, h, w]
#   wc_ref : (Cout, Cin)        torch conv weight
#   cb/g/bt: (Cout, 1)          conv bias, GN gamma, GN beta (per-channel columns)
#   wf_ref : (W, Cout, N)       wf[w, c, m] = fc_w[m, c*W + w]
#   fb_ref : (1, N)             fc bias
#   o_ref  : (1, H, N)          o[h, m] = torch_fc_out[b, m, h]
# ----------------------------------------------------------------------------
def _fused_kernel(x_ref, wc_ref, cb_ref, g_ref, bt_ref, wf_ref, fb_ref, o_ref):
    x = x_ref[0]                                                    # (Cin, W*H) = (8, 128)

    # 1x1 conv: channel mixing on the MXU, lane-dense result (Cout, W*H) = (16, 128)
    y = jnp.dot(wc_ref[...], x, preferred_element_type=jnp.float32) + cb_ref[...]

    # GroupNorm (group_size == 1 -> per-channel stats over the 128 spatial lanes)
    inv_n = 1.0 / WH
    mean = jnp.sum(y, axis=1, keepdims=True) * inv_n                # (Cout, 1)
    d = y - mean
    var = jnp.sum(d * d, axis=1, keepdims=True) * inv_n             # biased, like torch GN
    act = jnp.maximum(d * lax.rsqrt(var + GN_EPS) * g_ref[...] + bt_ref[...], 0.0)

    # fc (Conv1d, kernel=1): out[h, m] = sum_{c,w} act[c, w*H+h] * fc_w[m, c*W+w] + b[m]
    # One 2-D transpose, then W static sublane slices + small MXU matmuls accumulated
    # into a lane-dense (H, N) = (16, 256) result.
    act_t = act.T                                                   # (W*H, Cout) = (128, 16)
    acc = jnp.zeros((IN_HEIGHT, FC_OUT), jnp.float32)
    for w in range(IN_WIDTH):
        a_w = act_t[w * IN_HEIGHT:(w + 1) * IN_HEIGHT, :]           # (H, Cout) = (16, 16)
        acc = acc + jnp.dot(a_w, wf_ref[w], preferred_element_type=jnp.float32)
    o_ref[0] = (acc + fb_ref[...]).astype(o_ref.dtype)


def fused_bev_features(x, conv_w, conv_b, gn_w, gn_b, fc_w3, fc_b):
    B = x.shape[0]
    return pl.pallas_call(
        _fused_kernel,
        out_shape=jax.ShapeDtypeStruct((B, IN_HEIGHT, FC_OUT), jnp.float32),
        grid=(B,),
        in_specs=[
            pl.BlockSpec((1, IN_CHANNELS, WH), lambda b: (b, 0, 0)),
            pl.BlockSpec((OUT_CHANNELS, IN_CHANNELS), lambda b: (0, 0)),
            pl.BlockSpec((OUT_CHANNELS, 1), lambda b: (0, 0)),
            pl.BlockSpec((OUT_CHANNELS, 1), lambda b: (0, 0)),
            pl.BlockSpec((OUT_CHANNELS, 1), lambda b: (0, 0)),
            pl.BlockSpec((IN_WIDTH, OUT_CHANNELS, FC_OUT), lambda b: (0, 0, 0)),
            pl.BlockSpec((1, FC_OUT), lambda b: (0, 0)),
        ],
        out_specs=pl.BlockSpec((1, IN_HEIGHT, FC_OUT), lambda b: (b, 0, 0)),
        compiler_params=pltpu.CompilerParams(dimension_semantics=("parallel",)),
    )(x, conv_w, conv_b, gn_w, gn_b, fc_w3, fc_b)


# ----------------------------------------------------------------------------
# Glue: per-sample vertical crop (F.pad with negative padding)
# TODO(synk): could be moved in-kernel (scalar-prefetch vmin + manual DMA from HBM);
# kept as a tiny fused XLA gather since the crop can run out of the image bounds.
# ----------------------------------------------------------------------------
def _crop_feature_map(fmap, calib_b):
    # fmap: (C_in, H_img, W);  replicates F.pad(fmap, [0, 0, -vmin, vmax - H_img])
    fv = calib_b[1, 1]
    cv = calib_b[1, 2]
    vmid = YMID * fv / ZMIN_G + cv
    vmin = jnp.floor(vmid - IN_HEIGHT / 2).astype(jnp.int32)
    rows = vmin + jnp.arange(IN_HEIGHT, dtype=jnp.int32)
    valid = (rows >= 0) & (rows < fmap.shape[1])
    rows_c = jnp.clip(rows, 0, fmap.shape[1] - 1)
    out = fmap[:, rows_c, :] * valid.astype(fmap.dtype)[None, :, None]
    return out                                                       # (C_in, H, W)


# ----------------------------------------------------------------------------
# Glue: Resampler (perspective projection + bilinear grid_sample, zeros padding,
# align_corners=False).
# TODO(synk): Resampler class source was not provided in the module; this follows the
# canonical Pyramid Occupancy Networks Resampler; the gather-heavy grid_sample is
# done in plain JAX (no clean Pallas equivalent at this tiny size).
# ----------------------------------------------------------------------------
def _make_grid(resolution, extents):
    x1, z1, x2, z2 = extents
    zvals = jnp.arange(z1, z2, resolution, dtype=jnp.float32)
    xvals = jnp.arange(x1, x2, resolution, dtype=jnp.float32)
    Z, X = jnp.meshgrid(zvals, xvals, indexing="ij")
    return jnp.stack([X, Z], axis=-1)          # (Nz, Nx, 2) with (x, z)


def _grid_sample_bilinear_zeros(img, coords):
    # img: (B, C, Hi, Wi); coords: (B, Ho, Wo, 2) normalized (x, y), align_corners=False
    B, C, Hi, Wi = img.shape
    x = coords[..., 0]
    y = coords[..., 1]
    ix = ((x + 1.0) * Wi - 1.0) / 2.0
    iy = ((y + 1.0) * Hi - 1.0) / 2.0
    ix0 = jnp.floor(ix)
    iy0 = jnp.floor(iy)
    ix1 = ix0 + 1.0
    iy1 = iy0 + 1.0
    wx1 = ix - ix0
    wx0 = 1.0 - wx1
    wy1 = iy - iy0
    wy0 = 1.0 - wy1

    def gather(iy_, ix_):
        valid = (ix_ >= 0) & (ix_ <= Wi - 1) & (iy_ >= 0) & (iy_ <= Hi - 1)
        ixc = jnp.clip(ix_, 0, Wi - 1).astype(jnp.int32)
        iyc = jnp.clip(iy_, 0, Hi - 1).astype(jnp.int32)
        bidx = jnp.arange(B)[:, None, None]
        vals = img[bidx, :, iyc, ixc]                      # (B, Ho, Wo, C)
        return vals * valid[..., None].astype(img.dtype)

    v00 = gather(iy0, ix0)
    v01 = gather(iy0, ix1)
    v10 = gather(iy1, ix0)
    v11 = gather(iy1, ix1)
    out = (v00 * (wy0 * wx0)[..., None] + v01 * (wy0 * wx1)[..., None]
           + v10 * (wy1 * wx0)[..., None] + v11 * (wy1 * wx1)[..., None])
    return jnp.transpose(out, (0, 3, 1, 2))                # (B, C, Ho, Wo)


def resampler(features, calib, grid):
    # features: (B, C, H, out_depth)
    B = features.shape[0]
    near, far = ZMIN_G, ZMAX_G
    calib2 = calib[:, (0, 2), :][:, :, (0, 2)].reshape(B, 1, 1, 2, 2)
    cam = jnp.matmul(calib2, grid[None, ..., None])[..., 0]   # (B, Nz, Nx, 2)
    u = cam[..., 0] / cam[..., 1]
    u = u / features.shape[-1] * 2.0 - 1.0
    z = (cam[..., 1] - near) / (far - near) * 2.0 - 1.0
    coords = jnp.clip(jnp.stack([u, z], axis=-1), -1.1, 1.1)
    return _grid_sample_bilinear_zeros(features, coords)


# ----------------------------------------------------------------------------
# Parameters (deterministic synthetic init) and forward pass
# ----------------------------------------------------------------------------
def init_params(key):
    k1, k2, k3, k4 = jax.random.split(key, 4)
    conv_w = jax.random.normal(k1, (OUT_CHANNELS, IN_CHANNELS), jnp.float32) / math.sqrt(IN_CHANNELS)
    conv_b = jax.random.normal(k2, (OUT_CHANNELS,), jnp.float32) * 0.1
    gn_w = jnp.ones((OUT_CHANNELS,), jnp.float32)       # GroupNorm defaults
    gn_b = jnp.zeros((OUT_CHANNELS,), jnp.float32)

    fc_in = OUT_CHANNELS * IN_WIDTH
    fc_w = jax.random.normal(k3, (FC_OUT, fc_in), jnp.float32) / math.sqrt(fc_in)
    fc_b = jax.random.normal(k4, (FC_OUT,), jnp.float32) * 0.1
    # Pre-permute the fc weight for the in-kernel per-w accumulation:
    #   fc_w3[w, c, m] = fc_w[m, c*W + w]     (torch fc input channel index = c*W + w)
    fc_w3 = jnp.transpose(fc_w.reshape(FC_OUT, OUT_CHANNELS, IN_WIDTH), (2, 1, 0))

    bev_grid = _make_grid(RESOLUTION, GRID_EXTENTS)

    return dict(conv_w=conv_w,
                conv_b=conv_b.reshape(OUT_CHANNELS, 1),
                gn_w=gn_w.reshape(OUT_CHANNELS, 1),
                gn_b=gn_b.reshape(OUT_CHANNELS, 1),
                fc_w3=fc_w3,
                fc_b=fc_b.reshape(1, FC_OUT),
                bev_grid=bev_grid)


def forward(features_nchw, calib, params):
    B = features_nchw.shape[0]
    # 1) per-sample vertical crop (replicates torch.stack of _crop_feature_map)
    cropped = jax.vmap(_crop_feature_map)(features_nchw, calib)          # (B, Cin, H, W)
    # 2) width-major flatten for the fused kernel: x[b, cin, w*H + h] = cropped[b, cin, h, w]
    x = jnp.transpose(cropped, (0, 1, 3, 2)).reshape(B, IN_CHANNELS, WH)
    # 3) fused 1x1 conv + GroupNorm + ReLU + fc  (single Pallas kernel)
    bev = fused_bev_features(x, params["conv_w"], params["conv_b"],
                             params["gn_w"], params["gn_b"],
                             params["fc_w3"], params["fc_b"])            # (B, H, Cout*D)
    # 4) replicate torch contiguous layout (B, C*D, H) then .view(B, C, H, -1)
    fc_out = jnp.transpose(bev, (0, 2, 1))                               # (B, Cout*D, H)
    bev_feats = fc_out.reshape(B, OUT_CHANNELS, IN_HEIGHT, OUT_DEPTH)
    # 5) Resampler (grid_sample)
    return resampler(bev_feats, calib, params["bev_grid"])


# ----------------------------------------------------------------------------
if __name__ == "__main__":
    key = jax.random.PRNGKey(0)
    kf, kp = jax.random.split(key)

    B, H_IMG = 2, 20
    features = jax.random.normal(kf, (B, IN_CHANNELS, H_IMG, IN_WIDTH), jnp.float32)
    calib = jnp.array(
        [
            [[2.0, 0.0, 8.0],
             [0.0, FOCAL_LENGTH, 9.5],
             [0.0, 0.0, 1.0]],
            [[2.5, 0.0, 7.0],
             [0.0, FOCAL_LENGTH, 5.25],
             [0.0, 0.0, 1.0]],
        ],
        dtype=jnp.float32,
    )
    params = init_params(kp)

    out = jax.jit(forward)(features, calib, params)
    out = jax.block_until_ready(out)

    expected = (B, OUT_CHANNELS) + tuple(params["bev_grid"].shape[:2])
    assert out.shape == expected, (out.shape, expected)
    assert bool(jnp.all(jnp.isfinite(out)))
    print("KERNEL_OK")
</pallas_src>

<mosaic_0001>
module attributes {stable_mosaic.version = 11 : i64} {
  func.func @_fused_kernel(%arg0: i32, %arg1: memref<1x8x128xf32, #tpu.memory_space<vmem>>, %arg2: memref<16x8xf32, #tpu.memory_space<vmem>>, %arg3: memref<16x1xf32, #tpu.memory_space<vmem>>, %arg4: memref<16x1xf32, #tpu.memory_space<vmem>>, %arg5: memref<16x1xf32, #tpu.memory_space<vmem>>, %arg6: memref<8x16x256xf32, #tpu.memory_space<vmem>>, %arg7: memref<1x256xf32, #tpu.memory_space<vmem>>, %arg8: memref<1x16x256xf32, #tpu.memory_space<vmem>>) attributes {dimension_semantics = [#tpu.dimension_semantics<parallel>], iteration_bounds = array<i64: 2>, scalar_prefetch = 0 : i64, scratch_operands = 0 : i64, tpu.core_type = #tpu.core_type<tc>, window_params = [{transform_indices = @transform_0, window_bounds = array<i64: 1, 8, 128>}, {pipeline_mode = #tpu.pipeline_mode<synchronous>, transform_indices = @transform_1, window_bounds = array<i64: 16, 8>}, {pipeline_mode = #tpu.pipeline_mode<synchronous>, transform_indices = @transform_2, window_bounds = array<i64: 16, 1>}, {pipeline_mode = #tpu.pipeline_mode<synchronous>, transform_indices = @transform_3, window_bounds = array<i64: 16, 1>}, {pipeline_mode = #tpu.pipeline_mode<synchronous>, transform_indices = @transform_4, window_bounds = array<i64: 16, 1>}, {pipeline_mode = #tpu.pipeline_mode<synchronous>, transform_indices = @transform_5, window_bounds = array<i64: 8, 16, 256>}, {pipeline_mode = #tpu.pipeline_mode<synchronous>, transform_indices = @transform_6, window_bounds = array<i64: 1, 256>}, {transform_indices = @transform_7, window_bounds = array<i64: 1, 16, 256>}]} {
    %c0 = arith.constant 0 : index
    %c0_0 = arith.constant 0 : index
    %c0_1 = arith.constant 0 : index
    %0 = vector.load %arg1[%c0, %c0_0, %c0_1] : memref<1x8x128xf32, #tpu.memory_space<vmem>>, vector<1x8x128xf32>
    %1 = vector.shape_cast %0 : vector<1x8x128xf32> to vector<8x128xf32>
    %c0_2 = arith.constant 0 : index
    %c0_3 = arith.constant 0 : index
    %2 = vector.load %arg2[%c0_2, %c0_3] : memref<16x8xf32, #tpu.memory_space<vmem>>, vector<16x8xf32>
    %cst = arith.constant dense<0.000000e+00> : vector<16x128xf32>
    %3 = tpu.matmul %2, %1, %cst {dimension_numbers = #tpu.dot_dimension_numbers<[1], [0], [0], [1], [0, 0, 1, 1], [], []>} : vector<16x8xf32>, vector<8x128xf32>, vector<16x128xf32> -> vector<16x128xf32>
    %c0_4 = arith.constant 0 : index
    %c0_5 = arith.constant 0 : index
    %4 = vector.load %arg3[%c0_4, %c0_5] : memref<16x1xf32, #tpu.memory_space<vmem>>, vector<16x1xf32>
    %5 = vector.broadcast %4 : vector<16x1xf32> to vector<16x128xf32>
    %6 = arith.addf %3, %5 : vector<16x128xf32>
    %cst_6 = arith.constant dense<0.000000e+00> : vector<16xf32>
    %7 = vector.multi_reduction <add>, %6, %cst_6 [1] : vector<16x128xf32> to vector<16xf32>
    %8 = vector.shape_cast %7 : vector<16xf32> to vector<16x1xf32>
    %cst_7 = arith.constant 7.812500e-03 : f32
    %9 = vector.broadcast %cst_7 : f32 to vector<16x1xf32>
    %10 = arith.mulf %8, %9 : vector<16x1xf32>
    %11 = vector.broadcast %10 : vector<16x1xf32> to vector<16x128xf32>
    %12 = arith.subf %6, %11 : vector<16x128xf32>
    %13 = arith.mulf %12, %12 : vector<16x128xf32>
    %cst_8 = arith.constant dense<0.000000e+00> : vector<16xf32>
    %14 = vector.multi_reduction <add>, %13, %cst_8 [1] : vector<16x128xf32> to vector<16xf32>
    %15 = vector.shape_cast %14 : vector<16xf32> to vector<16x1xf32>
    %cst_9 = arith.constant 7.812500e-03 : f32
    %16 = vector.broadcast %cst_9 : f32 to vector<16x1xf32>
    %17 = arith.mulf %15, %16 : vector<16x1xf32>
    %cst_10 = arith.constant 9.99999974E-6 : f32
    %18 = vector.broadcast %cst_10 : f32 to vector<16x1xf32>
    %19 = arith.addf %17, %18 : vector<16x1xf32>
    %20 = math.rsqrt %19 : vector<16x1xf32>
    %21 = vector.broadcast %20 : vector<16x1xf32> to vector<16x128xf32>
    %22 = arith.mulf %12, %21 : vector<16x128xf32>
    %c0_11 = arith.constant 0 : index
    %c0_12 = arith.constant 0 : index
    %23 = vector.load %arg4[%c0_11, %c0_12] : memref<16x1xf32, #tpu.memory_space<vmem>>, vector<16x1xf32>
    %24 = vector.broadcast %23 : vector<16x1xf32> to vector<16x128xf32>
    %25 = arith.mulf %22, %24 : vector<16x128xf32>
    %c0_13 = arith.constant 0 : index
    %c0_14 = arith.constant 0 : index
    %26 = vector.load %arg5[%c0_13, %c0_14] : memref<16x1xf32, #tpu.memory_space<vmem>>, vector<16x1xf32>
    %27 = vector.broadcast %26 : vector<16x1xf32> to vector<16x128xf32>
    %28 = arith.addf %25, %27 : vector<16x128xf32>
    %cst_15 = arith.constant 0.000000e+00 : f32
    %29 = vector.broadcast %cst_15 : f32 to vector<16x128xf32>
    %30 = arith.maximumf %28, %29 : vector<16x128xf32>
    %31 = tpu.transpose %30, [1, 0] : vector<16x128xf32> -> vector<128x16xf32>
    %cst_16 = arith.constant 0.000000e+00 : f32
    %32 = vector.broadcast %cst_16 : f32 to vector<16x256xf32>
    %33 = vector.extract_strided_slice %31 {offsets = [0, 0], sizes = [16, 16], strides = [1, 1]} : vector<128x16xf32> to vector<16x16xf32>
    %c0_17 = arith.constant 0 : index
    %c0_18 = arith.constant 0 : index
    %c0_19 = arith.constant 0 : index
    %34 = vector.load %arg6[%c0_17, %c0_18, %c0_19] : memref<8x16x256xf32, #tpu.memory_space<vmem>>, vector<1x16x256xf32>
    %35 = vector.shape_cast %34 : vector<1x16x256xf32> to vector<16x256xf32>
    %cst_20 = arith.constant dense<0.000000e+00> : vector<16x256xf32>
    %36 = tpu.matmul %33, %35, %cst_20 {dimension_numbers = #tpu.dot_dimension_numbers<[1], [0], [0], [1], [0, 0, 1, 1], [], []>} : vector<16x16xf32>, vector<16x256xf32>, vector<16x256xf32> -> vector<16x256xf32>
    %37 = arith.addf %32, %36 : vector<16x256xf32>
    %38 = vector.extract_strided_slice %31 {offsets = [16, 0], sizes = [16, 16], strides = [1, 1]} : vector<128x16xf32> to vector<16x16xf32>
    %c1 = arith.constant 1 : index
    %c0_21 = arith.constant 0 : index
    %c0_22 = arith.constant 0 : index
    %39 = vector.load %arg6[%c1, %c0_21, %c0_22] : memref<8x16x256xf32, #tpu.memory_space<vmem>>, vector<1x16x256xf32>
    %40 = vector.shape_cast %39 : vector<1x16x256xf32> to vector<16x256xf32>
    %cst_23 = arith.constant dense<0.000000e+00> : vector<16x256xf32>
    %41 = tpu.matmul %38, %40, %cst_23 {dimension_numbers = #tpu.dot_dimension_numbers<[1], [0], [0], [1], [0, 0, 1, 1], [], []>} : vector<16x16xf32>, vector<16x256xf32>, vector<16x256xf32> -> vector<16x256xf32>
    %42 = arith.addf %37, %41 : vector<16x256xf32>
    %43 = vector.extract_strided_slice %31 {offsets = [32, 0], sizes = [16, 16], strides = [1, 1]} : vector<128x16xf32> to vector<16x16xf32>
    %c2 = arith.constant 2 : index
    %c0_24 = arith.constant 0 : index
    %c0_25 = arith.constant 0 : index
    %44 = vector.load %arg6[%c2, %c0_24, %c0_25] : memref<8x16x256xf32, #tpu.memory_space<vmem>>, vector<1x16x256xf32>
    %45 = vector.shape_cast %44 : vector<1x16x256xf32> to vector<16x256xf32>
    %cst_26 = arith.constant dense<0.000000e+00> : vector<16x256xf32>
    %46 = tpu.matmul %43, %45, %cst_26 {dimension_numbers = #tpu.dot_dimension_numbers<[1], [0], [0], [1], [0, 0, 1, 1], [], []>} : vector<16x16xf32>, vector<16x256xf32>, vector<16x256xf32> -> vector<16x256xf32>
    %47 = arith.addf %42, %46 : vector<16x256xf32>
    %48 = vector.extract_strided_slice %31 {offsets = [48, 0], sizes = [16, 16], strides = [1, 1]} : vector<128x16xf32> to vector<16x16xf32>
    %c3 = arith.constant 3 : index
    %c0_27 = arith.constant 0 : index
    %c0_28 = arith.constant 0 : index
    %49 = vector.load %arg6[%c3, %c0_27, %c0_28] : memref<8x16x256xf32, #tpu.memory_space<vmem>>, vector<1x16x256xf32>
    %50 = vector.shape_cast %49 : vector<1x16x256xf32> to vector<16x256xf32>
    %cst_29 = arith.constant dense<0.000000e+00> : vector<16x256xf32>
    %51 = tpu.matmul %48, %50, %cst_29 {dimension_numbers = #tpu.dot_dimension_numbers<[1], [0], [0], [1], [0, 0, 1, 1], [], []>} : vector<16x16xf32>, vector<16x256xf32>, vector<16x256xf32> -> vector<16x256xf32>
    %52 = arith.addf %47, %51 : vector<16x256xf32>
    %53 = vector.extract_strided_slice %31 {offsets = [64, 0], sizes = [16, 16], strides = [1, 1]} : vector<128x16xf32> to vector<16x16xf32>
    %c4 = arith.constant 4 : index
    %c0_30 = arith.constant 0 : index
    %c0_31 = arith.constant 0 : index
    %54 = vector.load %arg6[%c4, %c0_30, %c0_31] : memref<8x16x256xf32, #tpu.memory_space<vmem>>, vector<1x16x256xf32>
    %55 = vector.shape_cast %54 : vector<1x16x256xf32> to vector<16x256xf32>
    %cst_32 = arith.constant dense<0.000000e+00> : vector<16x256xf32>
    %56 = tpu.matmul %53, %55, %cst_32 {dimension_numbers = #tpu.dot_dimension_numbers<[1], [0], [0], [1], [0, 0, 1, 1], [], []>} : vector<16x16xf32>, vector<16x256xf32>, vector<16x256xf32> -> vector<16x256xf32>
    %57 = arith.addf %52, %56 : vector<16x256xf32>
    %58 = vector.extract_strided_slice %31 {offsets = [80, 0], sizes = [16, 16], strides = [1, 1]} : vector<128x16xf32> to vector<16x16xf32>
    %c5 = arith.constant 5 : index
    %c0_33 = arith.constant 0 : index
    %c0_34 = arith.constant 0 : index
    %59 = vector.load %arg6[%c5, %c0_33, %c0_34] : memref<8x16x256xf32, #tpu.memory_space<vmem>>, vector<1x16x256xf32>
    %60 = vector.shape_cast %59 : vector<1x16x256xf32> to vector<16x256xf32>
    %cst_35 = arith.constant dense<0.000000e+00> : vector<16x256xf32>
    %61 = tpu.matmul %58, %60, %cst_35 {dimension_numbers = #tpu.dot_dimension_numbers<[1], [0], [0], [1], [0, 0, 1, 1], [], []>} : vector<16x16xf32>, vector<16x256xf32>, vector<16x256xf32> -> vector<16x256xf32>
    %62 = arith.addf %57, %61 : vector<16x256xf32>
    %63 = vector.extract_strided_slice %31 {offsets = [96, 0], sizes = [16, 16], strides = [1, 1]} : vector<128x16xf32> to vector<16x16xf32>
    %c6 = arith.constant 6 : index
    %c0_36 = arith.constant 0 : index
    %c0_37 = arith.constant 0 : index
    %64 = vector.load %arg6[%c6, %c0_36, %c0_37] : memref<8x16x256xf32, #tpu.memory_space<vmem>>, vector<1x16x256xf32>
    %65 = vector.shape_cast %64 : vector<1x16x256xf32> to vector<16x256xf32>
    %cst_38 = arith.constant dense<0.000000e+00> : vector<16x256xf32>
    %66 = tpu.matmul %63, %65, %cst_38 {dimension_numbers = #tpu.dot_dimension_numbers<[1], [0], [0], [1], [0, 0, 1, 1], [], []>} : vector<16x16xf32>, vector<16x256xf32>, vector<16x256xf32> -> vector<16x256xf32>
    %67 = arith.addf %62, %66 : vector<16x256xf32>
    %68 = vector.extract_strided_slice %31 {offsets = [112, 0], sizes = [16, 16], strides = [1, 1]} : vector<128x16xf32> to vector<16x16xf32>
    %c7 = arith.constant 7 : index
    %c0_39 = arith.constant 0 : index
    %c0_40 = arith.constant 0 : index
    %69 = vector.load %arg6[%c7, %c0_39, %c0_40] : memref<8x16x256xf32, #tpu.memory_space<vmem>>, vector<1x16x256xf32>
    %70 = vector.shape_cast %69 : vector<1x16x256xf32> to vector<16x256xf32>
    %cst_41 = arith.constant dense<0.000000e+00> : vector<16x256xf32>
    %71 = tpu.matmul %68, %70, %cst_41 {dimension_numbers = #tpu.dot_dimension_numbers<[1], [0], [0], [1], [0, 0, 1, 1], [], []>} : vector<16x16xf32>, vector<16x256xf32>, vector<16x256xf32> -> vector<16x256xf32>
    %72 = arith.addf %67, %71 : vector<16x256xf32>
    %c0_42 = arith.constant 0 : index
    %c0_43 = arith.constant 0 : index
    %73 = vector.load %arg7[%c0_42, %c0_43] : memref<1x256xf32, #tpu.memory_space<vmem>>, vector<1x256xf32>
    %74 = vector.broadcast %73 : vector<1x256xf32> to vector<16x256xf32>
    %75 = arith.addf %72, %74 : vector<16x256xf32>
    %c0_44 = arith.constant 0 : index
    %c0_45 = arith.constant 0 : index
    %c0_46 = arith.constant 0 : index
    %76 = vector.load %arg8[%c0_44, %c0_45, %c0_46] : memref<1x16x256xf32, #tpu.memory_space<vmem>>, vector<1x16x256xf32>
    %77 = vector.shape_cast %76 : vector<1x16x256xf32> to vector<16x256xf32>
    %78 = vector.shape_cast %75 : vector<16x256xf32> to vector<1x16x256xf32>
    tpu.vector_store %arg8[%c0_44, %c0_45, %c0_46], %78 {strides = array<i32>} : memref<1x16x256xf32, #tpu.memory_space<vmem>>, vector<1x16x256xf32>,
    return
  }
  func.func @transform_0(%arg0: i32) -> (i32, i32, i32) {
    %c0_i32 = arith.constant 0 : i32
    %c0_i32_0 = arith.constant 0 : i32
    %c0_i32_1 = arith.constant 0 : i32
    return %arg0, %c0_i32, %c0_i32_0 : i32, i32, i32
  }
  func.func @transform_1(%arg0: i32) -> (i32, i32) {
    %c0_i32 = arith.constant 0 : i32
    %c0_i32_0 = arith.constant 0 : i32
    %c0_i32_1 = arith.constant 0 : i32
    return %c0_i32, %c0_i32_0 : i32, i32
  }
  func.func @transform_2(%arg0: i32) -> (i32, i32) {
    %c0_i32 = arith.constant 0 : i32
    %c0_i32_0 = arith.constant 0 : i32
    %c0_i32_1 = arith.constant 0 : i32
    return %c0_i32, %c0_i32_0 : i32, i32
  }
  func.func @transform_3(%arg0: i32) -> (i32, i32) {
    %c0_i32 = arith.constant 0 : i32
    %c0_i32_0 = arith.constant 0 : i32
    %c0_i32_1 = arith.constant 0 : i32
    return %c0_i32, %c0_i32_0 : i32, i32
  }
  func.func @transform_4(%arg0: i32) -> (i32, i32) {
    %c0_i32 = arith.constant 0 : i32
    %c0_i32_0 = arith.constant 0 : i32
    %c0_i32_1 = arith.constant 0 : i32
    return %c0_i32, %c0_i32_0 : i32, i32
  }
  func.func @transform_5(%arg0: i32) -> (i32, i32, i32) {
    %c0_i32 = arith.constant 0 : i32
    %c0_i32_0 = arith.constant 0 : i32
    %c0_i32_1 = arith.constant 0 : i32
    %c0_i32_2 = arith.constant 0 : i32
    return %c0_i32, %c0_i32_0, %c0_i32_1 : i32, i32, i32
  }
  func.func @transform_6(%arg0: i32) -> (i32, i32) {
    %c0_i32 = arith.constant 0 : i32
    %c0_i32_0 = arith.constant 0 : i32
    %c0_i32_1 = arith.constant 0 : i32
    return %c0_i32, %c0_i32_0 : i32, i32
  }
  func.func @transform_7(%arg0: i32) -> (i32, i32, i32) {
    %c0_i32 = arith.constant 0 : i32
    %c0_i32_0 = arith.constant 0 : i32
    %c0_i32_1 = arith.constant 0 : i32
    return %arg0, %c0_i32, %c0_i32_0 : i32, i32, i32
  }
}

</mosaic_0001>

<bundles_post_ra>
// kernel: forward.1
= control target key start
LH: loop header
LB: loop body
LE: loop exit
PB: predicated region body
PF: predicated region fallthrough
CT: control target
= control target key end

     0   :  { %s1451_s24 = smov 0   ;;  %s1629_s0 = inlined_call_operand.vmem [shape: f32[2,8,128], index: 0, kind: input, shape index: {}]   ;;  %s1630_s1 = inlined_call_operand.vmem [shape: f32[16,8], index: 1, kind: input, shape index: {}]   ;;  %s1631_s2 = inlined_call_operand.vmem [shape: f32[16,1], index: 2, kind: input, shape index: {}]   ;;  %s1632_s3 = inlined_call_operand.vmem [shape: f32[16,1], index: 3, kind: input, shape index: {}]   ;;  %s1633_s4 = inlined_call_operand.vmem [shape: f32[16,1], index: 4, kind: input, shape index: {}]   ;;  %s1634_s5 = inlined_call_operand.vmem [shape: f32[8,16,256], index: 5, kind: input, shape index: {}]   ;;  %s1635_s6 = inlined_call_operand.vmem [shape: f32[1,256], index: 6, kind: input, shape index: {}]   ;;  %s1636_s7 = inlined_call_operand.vmem [shape: f32[2,16,256], index: 7, kind: output, shape index: {}]  }
   0x1 LB: > { %s1260_s25 = sadd.s32 4294967295, %s1407_s24   ;;  %p1264_p0 = scmp.ge.s32.totalorder %s1407_s24, 1  ;;  %s1407_s24 = sphi %s1451_s24, %s17_s24  }
   0x2   : > { %p236_p1 = scmp.lt.s32.totalorder %s1407_s24, 3 }
   0x4   : > { %p237_p2 = pnand %p1264_p0, %p236_p1 }
   0x5   : > { %p267_p3 = scmp.lt.s32.totalorder (!%p237_p2), %s1260_s25, 1  ;;  %v277_v0 = vld [vmem:[%s1630_s1] sm:$0xff] (!%p237_p2)  ;;  %vm291_vm0 = vcmask (!%p237_p2), 64512   ;;  %v1409_v2 = vmov (!%p237_p2), 0   ;;  %v280_v3 = vld [vmem:[%s1631_s2 + $0x8] sm:$0xff] (!%p237_p2)  ;;  %v1273_v45 = vld [vmem:[%s1634_s5 + $0x38] sm:$0xff] (!%p237_p2) }
   0x6   : > { %240 = sbr.rel (%p237_p2) target bundleno = 954 (0x3ba), region = 48  ;;  %v279_v1 = vld [vmem:[%s1631_s2] sm:$0xff] (!%p237_p2)  ;;  %1322 = vmatprep.mubr.msk.f32.mxu0 (!%p237_p2), %vm291_vm0, %v277_v0  ;;  %1395 = vset.pattern.permute.xlu0 (!%p237_p2), %v1409_v2  ;;  %v278_v5 = vld [vmem:[%s1630_s1 + $0x8] sm:$0xff] (!%p237_p2)  ;;  %v1272_v48 = vld [vmem:[%s1634_s5 + $0x30] sm:$0xff] (!%p237_p2)  ;;  %v1410_v50 = vmov (!%p237_p2), 0.0   ;;  %vm466_vm1 = vcmask (!%p237_p2), 130048  }
   0x7   : > { %283 = vperm.xlu0 (!%p237_p2), %1395, %v279_v1   ;;  %1396 = vset.pattern.permute.xlu1 (!%p237_p2), %v1409_v2  ;;  %v395_v20 = vld [vmem:[%s1632_s3] sm:$0xff] (!%p237_p2)  ;;  %v396_v21 = vld [vmem:[%s1632_s3 + $0x8] sm:$0xff] (!%p237_p2)  ;;  %v460_v52 = vld [vmem:[%s1634_s5 + $0x18] sm:$0xff] (!%p237_p2) }
   0x8   : > { %v409_v22 = vld [vmem:[%s1633_s4] sm:$0xff] (!%p237_p2)  ;;  %v410_v23 = vld [vmem:[%s1633_s4 + $0x8] sm:$0xff] (!%p237_p2)  ;;  %892 = vmatprep.mubr.f32.mxu1 (!%p237_p2), %v1410_v50  ;;  %v1293_v55 = vld [vmem:[%s1634_s5 + $0x98] sm:$0xff] (!%p237_p2) }
   0x9   : > { %v1271_v44 = vld [vmem:[%s1634_s5 + $0x28] sm:$0xff] (!%p237_p2)  ;;  %v1270_v47 = vld [vmem:[%s1634_s5 + $0x20] sm:$0xff] (!%p237_p2)  ;;  %v1292_v58 = vld [vmem:[%s1634_s5 + $0x90] sm:$0xff] (!%p237_p2) }
   0xa   : > { %v1325_v46 = vpack.c.bf16 (!%p237_p2), %v1273_v45, %v1271_v44  ;;  %v1327_v49 = vpack.c.bf16 (!%p237_p2), %v1272_v48, %v1270_v47  ;;  %v458_v51 = vld [vmem:[%s1634_s5 + $0x8] sm:$0xff] (!%p237_p2)  ;;  %v1290_v57 = vld [vmem:[%s1634_s5 + $0x80] sm:$0xff] (!%p237_p2)  ;;  %v1299_v61 = vld [vmem:[%s1634_s5 + $0xb8] sm:$0xff] (!%p237_p2) }
   0xb   : > { %288 = vperm.xlu0 (!%p237_p2), %1395, %v280_v3   ;;  %v1329_v53 = vpack.c.bf16 (!%p237_p2), %v460_v52, %v458_v51  ;;  %v1291_v54 = vld [vmem:[%s1634_s5 + $0x88] sm:$0xff] (!%p237_p2)  ;;  %v1343_v59 = vpack.c.bf16 (!%p237_p2), %v1292_v58, %v1290_v57  ;;  %v457_v0 = vld [vmem:[%s1634_s5] sm:$0xff] (!%p237_p2)  ;;  %v459_v1 = vld [vmem:[%s1634_s5 + $0x10] sm:$0xff] (!%p237_p2) }
   0xc   : > { %v1341_v56 = vpack.c.bf16 (!%p237_p2), %v1293_v55, %v1291_v54  ;;  %v1297_v60 = vld [vmem:[%s1634_s5 + $0xa8] sm:$0xff] (!%p237_p2) }
   0xd   : > { %s1638_s25 = smov (!%p267_p3, %s1260_s25), 1  ;;  %v1345_v62 = vpack.c.bf16 %v1299_v61, %v1297_v60  ;;  %v1279_v3 = vld [vmem:[%s1634_s5 + $0x48] sm:$0xff] }
   0xe   : > { %s1265_s9 = sshll.u32 %s1638_s25, 3  ;;  %1342 = vmatprep.subr.bf16.mxu1 %v1341_v56  ;;  %s1316_s28 = sshll.u32 %s1638_s25, 5 }
   0xf   : > { %s270_s12 = scalar_lea.vmem %s1629_s0, %s1265_s9  ;;  %1344 = vmatpush1.bf16.msra.mxu1 %v1343_v59  ;;  %s275_s8 = scalar_lea.vmem %s1636_s7, %s1316_s28 }
  0x10   : > { %v276_v4 = vld [vmem:[%s270_s12] sm:$0xff]  ;;  %1346 = vmatprep.subr.bf16.mxu1 %v1345_v62 }
  0x11   : > { %1320 = vmatprep.subr.mxu0 %v276_v4 }
  0x12   : > { %1321 = vmatpush3.msra.mxu0 %v276_v4  ;;  %v1281_v4 = vld [vmem:[%s1634_s5 + $0x58] sm:$0xff] }
  0x13   : > { %1323 = vmatmul.mubr.msk.f32.vlgmr.msra.gmra.mrb[0].mxu0 %vm291_vm0, %v278_v5  ;;  %1326 = vmatprep.subr.bf16.mxu0 %v1325_v46  ;;  %v1331_v5 = vpack.c.bf16 %v459_v1, %v457_v0 }
  0x14   : > { %537 = vmatprep.mubr.f32.mxu0 %v1410_v50  ;;  %1328 = vmatpush1.bf16.msra.mxu0 %v1327_v49  ;;  %v1187_v49 = vlaneseq }
  0x15   : > { %1330 = vmatprep.subr.bf16.mxu0 %v1329_v53  ;;  %v1185_v53 = vld [vmem:[%s1635_s6] sm:$0x3] }
  0x16   : > { %v1188_v51 = vshrl.u32 %v1187_v49, 7 }
  0x18   : > { %v1189_v52 = vsub.s32 0, %v1188_v51  ;;  %v1193_v54 = vsub.s32 1, %v1188_v51 }
  0x1a   : > { %v1190_v55 = vrot.slane %v1185_v53, %v1189_v52  ;;  %v1194_v57 = vrot.slane %v1185_v53, %v1193_v54 }
  0x86   : > { %v284_v6 = vpop.permute.xlu0 %283 }
  0x8a   : > { %v289_v10 = vpop.permute.xlu0 %288 }
  0xe6   : > { %v1324_v7 = vpop.f32.mrb[0].mxu0 }
  0xe7   : > { %v364_v8 = vpop.f32.mrb[1].mxu0  ;;  %v370_v11 = vadd.f32 %v1324_v7, %v289_v10 }
  0xe8   : > { %v365_v9 = vadd.f32 %v364_v8, %v284_v6  ;;  %v1333_v6 = vpack.c.bf16 %v1281_v4, %v1279_v3  ;;  %v1278_v8 = vld [vmem:[%s1634_s5 + $0x40] sm:$0xff] }
  0xea   : > { %373 = vadd.xlane.f32.xlu1 %v365_v9 }
  0xee   : > { %375 = vadd.xlane.f32.xlu1 %v370_v11 }
 0x177   : > { %v374_v12 = vpop.xlane.xlu1 %373 }
 0x178   : > { %v377_v13 = vmul.f32 0.0078125, %v374_v12  ;;  %v1287_v12 = vld [vmem:[%s1634_s5 + $0x78] sm:$0xff] }
 0x17a   : > { %v379_v14 = vsub.f32 %v365_v9, %v377_v13  ;;  %v1280_v9 = vld [vmem:[%s1634_s5 + $0x50] sm:$0xff] }
 0x17b   : > { %v376_v15 = vpop.xlane.xlu1 %375  ;;  %v1335_v13 = vpack.c.bf16 %v1280_v9, %v1278_v8 }
 0x17c   : > { %v378_v16 = vmul.f32 0.0078125, %v376_v15  ;;  %v381_v17 = vmul.f32 %v379_v14, %v379_v14 }
 0x17e   : > { %v380_v18 = vsub.f32 %v370_v11, %v378_v16  ;;  %383 = vadd.xlane.f32.xlu0 %v381_v17  ;;  %v1285_v11 = vld [vmem:[%s1634_s5 + $0x68] sm:$0xff]  ;;  %v1284_v16 = vld [vmem:[%s1634_s5 + $0x60] sm:$0xff]  ;;  %v1286_v17 = vld [vmem:[%s1634_s5 + $0x70] sm:$0xff] }
 0x180   : > { %v382_v19 = vmul.f32 %v380_v18, %v380_v18 }
 0x182   : > { %385 = vadd.xlane.f32.xlu1 %v382_v19  ;;  %v1339_v19 = vpack.c.bf16 %v1286_v17, %v1284_v16 }
 0x193   : > { %399 = vperm.xlu1 %1396, %v395_v20  }
 0x197   : > { %404 = vperm.xlu1 %1396, %v396_v21   ;;  %v1296_v21 = vld [vmem:[%s1634_s5 + $0xa0] sm:$0xff] }
 0x19b   : > { %413 = vperm.xlu1 %1396, %v409_v22   ;;  %v1298_v22 = vld [vmem:[%s1634_s5 + $0xb0] sm:$0xff] }
 0x19f   : > { %418 = vperm.xlu1 %1396, %v410_v23  }
 0x20b   : > { %v384_v24 = vpop.xlane.xlu0 %383 }
 0x20c   : > { %v387_v25 = vmul.f32 0.0078125, %v384_v24  ;;  %v1303_v24 = vld [vmem:[%s1634_s5 + $0xc8] sm:$0xff] }
 0x20e   : > { %v389_v26 = vadd.f32 1e-05, %v387_v25  ;;  %v1305_v25 = vld [vmem:[%s1634_s5 + $0xd8] sm:$0xff] }
 0x20f   : > { %v386_v27 = vpop.xlane.xlu1 %385 }
 0x210   : > { %1397 = vrsqrt.f32 %v389_v26  ;;  %v388_v28 = vmul.f32 0.0078125, %v386_v27  ;;  %v1347_v26 = vpack.c.bf16 %v1298_v22, %v1296_v21  ;;  %v1349_v27 = vpack.c.bf16 %v1305_v25, %v1303_v24 }
 0x212   : > { %v390_v29 = vadd.f32 1e-05, %v388_v28 }
 0x213   : > { %v400_v30 = vpop.permute.xlu1 %399 }
 0x214   : > { %1399 = vrsqrt.f32 %v390_v29  ;;  %v1302_v29 = vld [vmem:[%s1634_s5 + $0xc0] sm:$0xff] }
 0x217   : > { %v405_v31 = vpop.permute.xlu1 %404 }
 0x21a   : > { %v1398_v32 = vpop.eup %1397 }
 0x21b   : > { %v393_v33 = vmul.f32 %v1398_v32, %v379_v14  ;;  %v414_v34 = vpop.permute.xlu1 %413  ;;  %v1337_v14 = vpack.c.bf16 %v1287_v12, %v1285_v11  ;;  %v1309_v32 = vld [vmem:[%s1634_s5 + $0xe8] sm:$0xff] }
 0x21d   : > { %v407_v35 = vmul.f32 %v400_v30, %v393_v33  ;;  %v1304_v30 = vld [vmem:[%s1634_s5 + $0xd0] sm:$0xff]  ;;  %v1311_v33 = vld [vmem:[%s1634_s5 + $0xf8] sm:$0xff] }
 0x21e   : > { %v1400_v36 = vpop.eup %1399 }
 0x21f   : > { %v394_v37 = vmul.f32 %v1400_v36, %v380_v18  ;;  %v421_v38 = vadd.f32 %v414_v34, %v407_v35  ;;  %v419_v41 = vpop.permute.xlu1 %418  ;;  %v1351_v34 = vpack.c.bf16 %v1304_v30, %v1302_v29  ;;  %v1353_v35 = vpack.c.bf16 %v1311_v33, %v1309_v32 }
 0x221   : > { %v408_v39 = vmul.f32 %v405_v31, %v394_v37  ;;  %v423_v40 = vmax.f32 %v421_v38, 0.0  ;;  %v1308_v37 = vld [vmem:[%s1634_s5 + $0xe0] sm:$0xff]  ;;  %v1310_v38 = vld [vmem:[%s1634_s5 + $0xf0] sm:$0xff] }
 0x223   : > { %v422_v42 = vadd.f32 %v419_v41, %v408_v39  ;;  %425 = vxpose.xlu0.b32.start [1/2] (short) %v423_v40, 128  ;;  %v1355_v40 = vpack.c.bf16 %v1310_v38, %v1308_v37 }
 0x225   : > { %v424_v43 = vmax.f32 %v422_v42, 0.0 }
 0x227   : > { %426 = vxpose.xlu0.b32.end [2/2] (short) %v424_v43, 128 }
 0x2a3   : > { %v441_v63 = vpop.trf.xlu0 }
 0x2a7   : > { %v442_v2 = vpop.trf.xlu0 }
 0x2ab   : > { %v443_v7 = vpop.trf.xlu0 }
 0x2ac   : > { %1274 = vmatmul.mubr.msk.f32.vlgmr.msra.gmra.mrb[2].mxu0 %vm466_vm1, %v443_v7 }
 0x2ad   : > { %543 = vmatprep.mubr.f32.mxu0 %v1410_v50  ;;  %1332 = vmatpush1.bf16.msra.mxu0 %v1331_v5 }
 0x2ae   : > { %1334 = vmatprep.subr.bf16.mxu0 %v1333_v6 }
 0x2af   : > { %v444_v10 = vpop.trf.xlu0 }
 0x2b0   : > { %1275 = vmatmul.mubr.msk.f32.gmra.mrb[4].mxu0 %vm466_vm1, %v444_v10 }
 0x2b1   : > { %620 = vmatprep.mubr.f32.mxu0 %v1410_v50 }
 0x2b3   : > { %v445_v15 = vpop.trf.xlu0 }
 0x2b4   : > { %1276 = vmatmul.mubr.msk.f32.vlgmr.msra.gmra.mrb[2].mxu0 %vm466_vm1, %v441_v63 }
 0x2b5   : > { %626 = vmatprep.mubr.f32.mxu0 %v1410_v50  ;;  %1336 = vmatpush1.bf16.msra.mxu0 %v1335_v13 }
 0x2b6   : > { %1338 = vmatprep.subr.bf16.mxu0 %v1337_v14 }
 0x2b7   : > { %v446_v18 = vpop.trf.xlu0 }
 0x2b8   : > { %1277 = vmatmul.mubr.msk.f32.gmra.mrb[4].mxu0 %vm466_vm1, %v442_v2 }
 0x2b9   : > { %708 = vmatprep.mubr.f32.mxu0 %v1410_v50 }
 0x2bb   : > { %v447_v20 = vpop.trf.xlu0 }
 0x2bc   : > { %1282 = vmatmul.mubr.msk.f32.vlgmr.msra.gmra.mrb[2].mxu0 %vm466_vm1, %v445_v15 }
 0x2bd   : > { %714 = vmatprep.mubr.f32.mxu0 %v1410_v50  ;;  %1340 = vmatpush1.bf16.msra.mxu0 %v1339_v19 }
 0x2bf   : > { %v448_v23 = vpop.trf.xlu0 }
 0x2c0   : > { %1283 = vmatmul.mubr.msk.f32.gmra.mrb[4].mxu0 %vm466_vm1, %v446_v18 }
 0x2c1   : > { %800 = vmatprep.mubr.f32.mxu0 %v1410_v50 }
 0x2c3   : > { %v449_v28 = vpop.trf.xlu0 }
 0x2c4   : > { %1288 = vmatmul.mubr.msk.f32.vlgmr.msra.gmra.mrb[2].mxu0 %vm466_vm1, %v447_v20  ;;  %1294 = vmatmul.mubr.msk.f32.vlgmr.msra.gmra.mrb[0].mxu1 %vm466_vm1, %v449_v28 }
 0x2c5   : > { %1348 = vmatpush1.bf16.msra.mxu1 %v1347_v26  ;;  %806 = vmatprep.mubr.f32.mxu0 %v1410_v50 }
 0x2c6   : > { %898 = vmatprep.mubr.f32.mxu1 %v1410_v50  ;;  %1350 = vmatprep.subr.bf16.mxu1 %v1349_v27 }
 0x2c7   : > { %v450_v31 = vpop.trf.xlu0 }
 0x2c8   : > { %1289 = vmatmul.mubr.msk.f32.gmra.mrb[4].mxu0 %vm466_vm1, %v448_v23  ;;  %1295 = vmatmul.mubr.msk.f32.gmra.mrb[2].mxu1 %vm466_vm1, %v450_v31 }
 0x2c9   : > { %984 = vmatprep.mubr.f32.mxu1 %v1410_v50 }
 0x2cb   : > { %v451_v36 = vpop.trf.xlu0 }
 0x2cc   : > { %1300 = vmatmul.mubr.msk.f32.vlgmr.msra.gmra.mrb[0].mxu1 %vm466_vm1, %v451_v36 }
 0x2cd   : > { %1352 = vmatpush1.bf16.msra.mxu1 %v1351_v34  ;;  %990 = vmatprep.mubr.f32.mxu1 %v1410_v50 }
 0x2ce   : > { %1354 = vmatprep.subr.bf16.mxu1 %v1353_v35 }
 0x2cf   : > { %v452_v39 = vpop.trf.xlu0 }
 0x2d0   : > { %1301 = vmatmul.mubr.msk.f32.gmra.mrb[2].mxu1 %vm466_vm1, %v452_v39 }
 0x2d1   : > { %1076 = vmatprep.mubr.f32.mxu1 %v1410_v50 }
 0x2d3   : > { %v453_v41 = vpop.trf.xlu0 }
 0x2d4   : > { %1306 = vmatmul.mubr.msk.f32.vlgmr.msra.gmra.mrb[0].mxu1 %vm466_vm1, %v453_v41 }
 0x2d5   : > { %1356 = vmatpush1.bf16.msra.mxu1 %v1355_v40  ;;  %1082 = vmatprep.mubr.f32.mxu1 %v1410_v50 }
 0x2d7   : > { %v454_v42 = vpop.trf.xlu0 }
 0x2d8   : > { %1307 = vmatmul.mubr.msk.f32.gmra.mrb[2].mxu1 %vm466_vm1, %v454_v42 }
 0x2d9   : > { %1168 = vmatprep.mubr.f32.mxu1 %v1410_v50 }
 0x2db   : > { %v455_v43 = vpop.trf.xlu0 }
 0x2dc   : > { %1312 = vmatmul.mubr.msk.f32.vlgmr.msra.gmra.mrb[0].mxu1 %vm466_vm1, %v455_v43 }
 0x2dd   : > { %1174 = vmatprep.mubr.f32.mxu1 %v1410_v50 }
 0x2df   : > { %v456_v44 = vpop.trf.xlu0 }
 0x2e0   : > { %1313 = vmatmul.mubr.msk.f32.gmra.mrb[2].mxu1 %vm466_vm1, %v456_v44 }
 0x397   : > { %v802_v45 = vpop.f32.mrb[2].mxu0 }
 0x398   : > { %v804_v46 = vpop.f32.mrb[3].mxu0 }
 0x39b   : > { %v808_v47 = vpop.f32.mrb[4].mxu0 }
 0x39c   : > { %v810_v48 = vpop.f32.mrb[5].mxu0 }
 0x3af   : > { %v1170_v56 = vpop.f32.mrb[0].mxu1 }
 0x3b0   : > { %v1357_v50 = vadd.f32 %v1170_v56, %v802_v45  ;;  %v1172_v58 = vpop.f32.mrb[1].mxu1 }
 0x3b1   : > { %v1358_v59 = vadd.f32 %v1172_v58, %v804_v46 }
 0x3b2   : > { %v1197_v60 = vadd.f32 %v1357_v50, %v1190_v55 }
 0x3b3   : > { %v1198_v61 = vadd.f32 %v1358_v59, %v1194_v57  ;;  %v1176_v62 = vpop.f32.mrb[2].mxu1 }
 0x3b4   : > { %1201 = vst [vmem:[%s275_s8] sm:$0xff] %v1197_v60  ;;  %v1359_v63 = vadd.f32 %v1176_v62, %v808_v47  ;;  %v1178_v0 = vpop.f32.mrb[3].mxu1 }
 0x3b5   : > { %1202 = vst [vmem:[%s275_s8 + $0x8] sm:$0xff] %v1198_v61  ;;  %v1360_v1 = vadd.f32 %v1178_v0, %v810_v48 }
 0x3b6   : > { %v1199_v2 = vadd.f32 %v1359_v63, %v1190_v55 }
 0x3b7   : > { %v1200_v3 = vadd.f32 %v1360_v1, %v1194_v57 }
 0x3b8   : > { %1203 = vst [vmem:[%s275_s8 + $0x10] sm:$0xff] %v1199_v2 }
 0x3b9   : > { %1204 = vst [vmem:[%s275_s8 + $0x18] sm:$0xff] %v1200_v3 }
 0x3ba PF: > { %s17_s24 = sadd.s32 1, %s1407_s24  }
 0x3bb   : > { %p14_p4 = scmp.ge.s32.totalorder %s17_s24, 4  }
 0x3bd   :  { %16 = sbr.rel (!%p14_p4) target bundleno = 1 (0x1), region = 85 }

</bundles_post_ra>
